<compile_context>
chip_gen: v5e
topology: v5e:2x2
jax: 0.10.0
libtpu: 0.0.40
codegen_flags: <defaults>
</compile_context>

<pallas_src>
import jax
import jax.numpy as jnp
from jax.experimental import pallas as pl
from jax.experimental.pallas import tpu as pltpu

NEG_SLOPE = 0.01  # PyTorch nn.LeakyReLU default


def _leaky(h):
    return jnp.where(h > 0, h, NEG_SLOPE * h)


def cnn_block_kernel(x_ref, w1_ref, w2_ref, w3_ref, b3_ref, o_ref):
    # x_ref : (1, C_in, hw_tile)   -- one image's channel-major pixel slab
    # w*_ref: (F, C_in) / (F, F)   -- PyTorch Conv2d (out, in) layout
    # b3_ref: (F, 1)               -- broadcast along lanes
    # o_ref : (1, F, hw_tile)
    x = x_ref[0]  # (C_in, hw_tile)
    h = jnp.dot(w1_ref[...], x, preferred_element_type=jnp.float32)
    h = _leaky(h)
    h = jnp.dot(w2_ref[...], h.astype(w2_ref.dtype), preferred_element_type=jnp.float32)
    h = _leaky(h)
    h = jnp.dot(w3_ref[...], h.astype(w3_ref.dtype), preferred_element_type=jnp.float32)
    h = h + b3_ref[...]
    h = _leaky(h)
    o_ref[0] = h.astype(o_ref.dtype)


def _pick_hw_tile(hw, cap=2048):
    """Largest lane-aligned spatial tile <= cap (or the full extent for tiny images)."""
    if hw <= 128:
        return hw                      # full extent: always a legal block shape
    if hw % 128 == 0:
        return min(hw, cap)
    rounded = ((hw + 127) // 128) * 128  # lane-aligned; Pallas masks the partial block
    return min(rounded, cap)


def cnn_block_forward(x_nchw, w1, w2, w3, b3, *, hw_tile=None, compute_dtype=None):
    """Fused CNNBlock forward.

    x_nchw: (N, C_in, H, W)
    w1: (F, C_in), w2: (F, F), w3: (F, F)  -- PyTorch Conv2d weight[:, :, 0, 0] layout
    b3: (F,)
    compute_dtype: optionally jnp.bfloat16 to halve matmul input traffic on v6e/v7x
                   (accumulation and activations stay f32; output keeps x's dtype).
    """
    N, C_in, H, W = x_nchw.shape
    F_feat = w1.shape[0]
    HW = H * W

    # Free reshape (no transpose): NCHW -> (N, C_in, H*W)
    x3 = x_nchw.reshape(N, C_in, HW)
    out_dtype = x_nchw.dtype

    if compute_dtype is not None:
        x3 = x3.astype(compute_dtype)
        w1 = w1.astype(compute_dtype)
        w2 = w2.astype(compute_dtype)
        w3 = w3.astype(compute_dtype)
    b3_2d = b3.astype(jnp.float32).reshape(F_feat, 1)

    if hw_tile is None:
        hw_tile = _pick_hw_tile(HW)
    grid = (N, pl.cdiv(HW, hw_tile))

    # Advisory cost hint for XLA's scheduler.
    in_bytes = jnp.dtype(x3.dtype).itemsize
    cost = pl.CostEstimate(
        flops=2 * N * HW * (C_in * F_feat + 2 * F_feat * F_feat),
        transcendentals=0,
        bytes_accessed=in_bytes * (N * HW * C_in + C_in * F_feat + 2 * F_feat * F_feat)
        + jnp.dtype(out_dtype).itemsize * N * HW * F_feat
        + 4 * F_feat,
    )

    out3 = pl.pallas_call(
        cnn_block_kernel,
        out_shape=jax.ShapeDtypeStruct((N, F_feat, HW), out_dtype),
        grid_spec=pltpu.PrefetchScalarGridSpec(
            num_scalar_prefetch=0,
            grid=grid,
            in_specs=[
                pl.BlockSpec((1, C_in, hw_tile), lambda n, j: (n, 0, j)),
                # Constant block index -> weights stay resident, no per-step re-DMA.
                pl.BlockSpec((F_feat, C_in), lambda n, j: (0, 0)),
                pl.BlockSpec((F_feat, F_feat), lambda n, j: (0, 0)),
                pl.BlockSpec((F_feat, F_feat), lambda n, j: (0, 0)),
                pl.BlockSpec((F_feat, 1), lambda n, j: (0, 0)),
            ],
            out_specs=pl.BlockSpec((1, F_feat, hw_tile), lambda n, j: (n, 0, j)),
        ),
        compiler_params=pltpu.CompilerParams(
            dimension_semantics=("parallel", "parallel"),
        ),
        cost_estimate=cost,
    )(x3, w1, w2, w3, b3_2d)

    # Free reshape: (N, F, H*W) -> NCHW.
    return out3.reshape(N, F_feat, H, W)


def _reference(x, w1, w2, w3, b3):
    h = jnp.einsum("oc,nchw->nohw", w1, x)
    h = jnp.where(h > 0, h, NEG_SLOPE * h)
    h = jnp.einsum("oc,nchw->nohw", w2, h)
    h = jnp.where(h > 0, h, NEG_SLOPE * h)
    h = jnp.einsum("oc,nchw->nohw", w3, h) + b3[None, :, None, None]
    h = jnp.where(h > 0, h, NEG_SLOPE * h)
    return h


if __name__ == "__main__":
    # Small shapes consistent with the module: batch=2, chan_in=4, spatial=16, n_feat=32
    N, C_in, H, W = 2, 4, 16, 16
    n_feat = 32

    key = jax.random.PRNGKey(0)
    kx, k1, k2, k3, kb, kx2 = jax.random.split(key, 6)

    x = jax.random.normal(kx, (N, C_in, H, W), dtype=jnp.float32)

    # PyTorch Conv2d weights are (out, in, 1, 1); we keep the squeezed (out, in) layout.
    w1 = jax.random.normal(k1, (n_feat, C_in), dtype=jnp.float32) * 0.1
    w2 = jax.random.normal(k2, (n_feat, n_feat), dtype=jnp.float32) * 0.1
    w3 = jax.random.normal(k3, (n_feat, n_feat), dtype=jnp.float32) * 0.1
    b3 = jax.random.normal(kb, (n_feat,), dtype=jnp.float32) * 0.1

    # Main test: lane-aligned spatial extent (H*W = 256).
    out = cnn_block_forward(x, w1, w2, w3, b3)
    jax.block_until_ready(out)
    r = _reference(x, w1, w2, w3, b3)
    assert out.shape == (N, n_feat, H, W), out.shape
    assert jnp.allclose(out, r, atol=1e-5, rtol=1e-5), float(jnp.max(jnp.abs(out - r)))

    # Secondary test: non-multiple-of-128 spatial extent exercises the masked partial block.
    H2, W2 = 20, 20
    x2 = jax.random.normal(kx2, (N, C_in, H2, W2), dtype=jnp.float32)
    out2 = cnn_block_forward(x2, w1, w2, w3, b3)
    jax.block_until_ready(out2)
    r2 = _reference(x2, w1, w2, w3, b3)
    assert out2.shape == (N, n_feat, H2, W2), out2.shape
    assert jnp.allclose(out2, r2, atol=1e-5, rtol=1e-5), float(jnp.max(jnp.abs(out2 - r2)))

    print("KERNEL_OK")
</pallas_src>

<mosaic_0001>
module attributes {stable_mosaic.version = 11 : i64} {
  func.func @cnn_block_kernel(%arg0: i32, %arg1: i32, %arg2: memref<1x4x256xf32, #tpu.memory_space<vmem>>, %arg3: memref<32x4xf32, #tpu.memory_space<vmem>>, %arg4: memref<32x32xf32, #tpu.memory_space<vmem>>, %arg5: memref<32x32xf32, #tpu.memory_space<vmem>>, %arg6: memref<32x1xf32, #tpu.memory_space<vmem>>, %arg7: memref<1x32x256xf32, #tpu.memory_space<vmem>>) attributes {dimension_semantics = [#tpu.dimension_semantics<parallel>, #tpu.dimension_semantics<parallel>], iteration_bounds = array<i64: 2, 1>, scalar_prefetch = 0 : i64, scratch_operands = 0 : i64, tpu.core_type = #tpu.core_type<tc>, window_params = [{transform_indices = @transform_0, window_bounds = array<i64: 1, 4, 256>}, {pipeline_mode = #tpu.pipeline_mode<synchronous>, transform_indices = @transform_1, window_bounds = array<i64: 32, 4>}, {pipeline_mode = #tpu.pipeline_mode<synchronous>, transform_indices = @transform_2, window_bounds = array<i64: 32, 32>}, {pipeline_mode = #tpu.pipeline_mode<synchronous>, transform_indices = @transform_3, window_bounds = array<i64: 32, 32>}, {pipeline_mode = #tpu.pipeline_mode<synchronous>, transform_indices = @transform_4, window_bounds = array<i64: 32, 1>}, {transform_indices = @transform_5, window_bounds = array<i64: 1, 32, 256>}]} {
    %c0 = arith.constant 0 : index
    %c0_0 = arith.constant 0 : index
    %c0_1 = arith.constant 0 : index
    %0 = vector.load %arg2[%c0, %c0_0, %c0_1] : memref<1x4x256xf32, #tpu.memory_space<vmem>>, vector<1x4x256xf32>
    %1 = vector.shape_cast %0 : vector<1x4x256xf32> to vector<4x256xf32>
    %c0_2 = arith.constant 0 : index
    %c0_3 = arith.constant 0 : index
    %2 = vector.load %arg3[%c0_2, %c0_3] : memref<32x4xf32, #tpu.memory_space<vmem>>, vector<32x4xf32>
    %cst = arith.constant dense<0.000000e+00> : vector<32x256xf32>
    %3 = tpu.matmul %2, %1, %cst {dimension_numbers = #tpu.dot_dimension_numbers<[1], [0], [0], [1], [0, 0, 1, 1], [], []>} : vector<32x4xf32>, vector<4x256xf32>, vector<32x256xf32> -> vector<32x256xf32>
    %cst_4 = arith.constant 0.000000e+00 : f32
    %4 = vector.broadcast %cst_4 : f32 to vector<32x256xf32>
    %5 = arith.cmpf ogt, %3, %4 : vector<32x256xf32>
    %cst_5 = arith.constant 0.00999999977 : f32
    %6 = vector.broadcast %cst_5 : f32 to vector<32x256xf32>
    %7 = arith.mulf %6, %3 : vector<32x256xf32>
    %8 = arith.select %5, %3, %7 : vector<32x256xi1>, vector<32x256xf32>
    %c0_6 = arith.constant 0 : index
    %c0_7 = arith.constant 0 : index
    %9 = vector.load %arg4[%c0_6, %c0_7] : memref<32x32xf32, #tpu.memory_space<vmem>>, vector<32x32xf32>
    %cst_8 = arith.constant dense<0.000000e+00> : vector<32x256xf32>
    %10 = tpu.matmul %9, %8, %cst_8 {dimension_numbers = #tpu.dot_dimension_numbers<[1], [0], [0], [1], [0, 0, 1, 1], [], []>} : vector<32x32xf32>, vector<32x256xf32>, vector<32x256xf32> -> vector<32x256xf32>
    %cst_9 = arith.constant 0.000000e+00 : f32
    %11 = vector.broadcast %cst_9 : f32 to vector<32x256xf32>
    %12 = arith.cmpf ogt, %10, %11 : vector<32x256xf32>
    %cst_10 = arith.constant 0.00999999977 : f32
    %13 = vector.broadcast %cst_10 : f32 to vector<32x256xf32>
    %14 = arith.mulf %13, %10 : vector<32x256xf32>
    %15 = arith.select %12, %10, %14 : vector<32x256xi1>, vector<32x256xf32>
    %c0_11 = arith.constant 0 : index
    %c0_12 = arith.constant 0 : index
    %16 = vector.load %arg5[%c0_11, %c0_12] : memref<32x32xf32, #tpu.memory_space<vmem>>, vector<32x32xf32>
    %cst_13 = arith.constant dense<0.000000e+00> : vector<32x256xf32>
    %17 = tpu.matmul %16, %15, %cst_13 {dimension_numbers = #tpu.dot_dimension_numbers<[1], [0], [0], [1], [0, 0, 1, 1], [], []>} : vector<32x32xf32>, vector<32x256xf32>, vector<32x256xf32> -> vector<32x256xf32>
    %c0_14 = arith.constant 0 : index
    %c0_15 = arith.constant 0 : index
    %18 = vector.load %arg6[%c0_14, %c0_15] : memref<32x1xf32, #tpu.memory_space<vmem>>, vector<32x1xf32>
    %19 = vector.broadcast %18 : vector<32x1xf32> to vector<32x256xf32>
    %20 = arith.addf %17, %19 : vector<32x256xf32>
    %cst_16 = arith.constant 0.000000e+00 : f32
    %21 = vector.broadcast %cst_16 : f32 to vector<32x256xf32>
    %22 = arith.cmpf ogt, %20, %21 : vector<32x256xf32>
    %cst_17 = arith.constant 0.00999999977 : f32
    %23 = vector.broadcast %cst_17 : f32 to vector<32x256xf32>
    %24 = arith.mulf %23, %20 : vector<32x256xf32>
    %25 = arith.select %22, %20, %24 : vector<32x256xi1>, vector<32x256xf32>
    %c0_18 = arith.constant 0 : index
    %c0_19 = arith.constant 0 : index
    %c0_20 = arith.constant 0 : index
    %26 = vector.load %arg7[%c0_18, %c0_19, %c0_20] : memref<1x32x256xf32, #tpu.memory_space<vmem>>, vector<1x32x256xf32>
    %27 = vector.shape_cast %26 : vector<1x32x256xf32> to vector<32x256xf32>
    %28 = vector.shape_cast %25 : vector<32x256xf32> to vector<1x32x256xf32>
    tpu.vector_store %arg7[%c0_18, %c0_19, %c0_20], %28 {strides = array<i32>} : memref<1x32x256xf32, #tpu.memory_space<vmem>>, vector<1x32x256xf32>,
    return
  }
  func.func @transform_0(%arg0: i32, %arg1: i32) -> (i32, i32, i32) {
    %c0_i32 = arith.constant 0 : i32
    %c0_i32_0 = arith.constant 0 : i32
    return %arg0, %c0_i32, %arg1 : i32, i32, i32
  }
  func.func @transform_1(%arg0: i32, %arg1: i32) -> (i32, i32) {
    %c0_i32 = arith.constant 0 : i32
    %c0_i32_0 = arith.constant 0 : i32
    %c0_i32_1 = arith.constant 0 : i32
    return %c0_i32, %c0_i32_0 : i32, i32
  }
  func.func @transform_2(%arg0: i32, %arg1: i32) -> (i32, i32) {
    %c0_i32 = arith.constant 0 : i32
    %c0_i32_0 = arith.constant 0 : i32
    %c0_i32_1 = arith.constant 0 : i32
    return %c0_i32, %c0_i32_0 : i32, i32
  }
  func.func @transform_3(%arg0: i32, %arg1: i32) -> (i32, i32) {
    %c0_i32 = arith.constant 0 : i32
    %c0_i32_0 = arith.constant 0 : i32
    %c0_i32_1 = arith.constant 0 : i32
    return %c0_i32, %c0_i32_0 : i32, i32
  }
  func.func @transform_4(%arg0: i32, %arg1: i32) -> (i32, i32) {
    %c0_i32 = arith.constant 0 : i32
    %c0_i32_0 = arith.constant 0 : i32
    %c0_i32_1 = arith.constant 0 : i32
    return %c0_i32, %c0_i32_0 : i32, i32
  }
  func.func @transform_5(%arg0: i32, %arg1: i32) -> (i32, i32, i32) {
    %c0_i32 = arith.constant 0 : i32
    %c0_i32_0 = arith.constant 0 : i32
    return %arg0, %c0_i32, %arg1 : i32, i32, i32
  }
}

</mosaic_0001>

<bundles_post_ra>
// kernel: tpu_custom_call.1
= control target key start
LH: loop header
LB: loop body
LE: loop exit
PB: predicated region body
PF: predicated region fallthrough
CT: control target
= control target key end

     0   :  { %10 = vsyncpa [#allocation3], 0  ;;  %s1169_s0 = inlined_call_operand.hbm [shape: f32[2,4,256], index: 0, kind: input, shape index: {}]   ;;  %s1170_s1 = inlined_call_operand.vmem [shape: f32[32,4], index: 1, kind: input, shape index: {}]   ;;  %s1171_s2 = inlined_call_operand.vmem [shape: f32[32,32], index: 2, kind: input, shape index: {}]   ;;  %s1172_s3 = inlined_call_operand.vmem [shape: f32[32,32], index: 3, kind: input, shape index: {}]   ;;  %s1173_s4 = inlined_call_operand.vmem [shape: f32[32,1], index: 4, kind: input, shape index: {}]   ;;  %s1174_s5 = inlined_call_operand.hbm [shape: f32[2,32,256], index: 5, kind: output, shape index: {}]  }
   0x1   :  { %12 = vsyncpa [#allocation3 + $0x1], 0 }
   0x2   :  { %13 = vsyncpa [#allocation4], 0 }
   0x3   :  { %15 = vsyncpa [#allocation4 + $0x1], 0  ;;  %s965_s18 = smov 0   ;;  %s967_s19 = smov 0  }
   0x4   :  { %s969_s20 = smov 0   ;;  %s971_s21 = smov 0  }
   0x5   :  { %s973_s22 = smov 0   ;;  %s975_s23 = smov 0  }
   0x6 LB: > { %s706_s24 = sadd.s32 4294967295, %s930_s23   ;;  %s707_s25 = sadd.s32 4294967294, %s930_s23   ;;  %s930_s23 = sphi %s975_s23, %s21_s23   ;;  %s926_s22 = sphi %s973_s22, %s1183_s22   ;;  %s922_s21 = sphi %s971_s21, %s1182_s21   ;;  %s918_s20 = sphi %s969_s20, %s1181_s20   ;;  %s914_s19 = sphi %s967_s19, %s1180_s19   ;;  %s910_s18 = sphi %s965_s18, %s1179_s18  }
   0x7   : > { %s33_s26 = sadd.s32 1, %s926_s22  ;;  %s42_s27 = sadd.s32 1, %s918_s20 }
   0x8   : > { %p35_p0 = scmp.ge.s32.totalorder %s33_s26, 2  ;;  %p49_p1 = scmp.ne.s32.totalorder %s918_s20, %s914_s19 }
   0x9   : > { %p50_p2 = scmp.eq.s32.totalorder %s930_s23, 0  ;;  %p55_p3 = scmp.ne.s32.totalorder %s914_s19, %s910_s18 }
   0xa   : > { %s1185_s26 = smov (%p35_p0, %s33_s26), 0  ;;  %p56_p5 = scmp.eq.s32.totalorder %s706_s24, 0 }
   0xb   : > { %p1006_p4 = por %p50_p2, %p49_p1  ;;  %s37_s29 = ssub.s32 %s926_s22, %s1185_s26 }
   0xc   : > { %p165_p6 = scmp.eq.s32.totalorder %s706_s24, 1  ;;  %p40_p7 = scmp.eq.s32.totalorder %s37_s29, 0 }
   0xd   : > { %p1012_p8 = por %p56_p5, %p55_p3  ;;  %p171_p10 = scmp.eq.s32.totalorder %s707_s25, 1 }
   0xe   : > { %p1016_p9 = por %p165_p6, %p49_p1  ;;  %p709_p12 = scmp.ge.s32.totalorder %s930_s23, 2 }
   0xf   : > { %s1021_s7 = scalar_select %p40_p7, %s918_s20, %s42_s27  }
  0x10   : > { %p1023_p11 = por %p171_p10, %p55_p3  ;;  %p763_p13 = scmp.lt.s32.totalorder %s930_s23, 2 }
  0x11   : > { %s203_s9 = sand.u32 1, %s918_s20   ;;  %s747_s11 = sshll.u32 %s926_s22, 3 }
  0x12   : > { %s710_s10 = sshll.u32 %s203_s9, 3  ;;  %s214_s14 = scalar_lea.hbm %s1169_s0, %s747_s11 }
  0x13   : > { %s207_s15 = scalar_lea.vmem [#allocation2], %s710_s10  ;;  %s216_s17 = sshll.u32 %s214_s14, 4  ;;  %s217_s17 = int_to_ptr.hbm [resolvable:$true] %s216_s17 }
  0x14   : > { %s218_s16 = sshll.u32 %s207_s15, 4  ;;  %p756_p0 = pnand %p763_p13, %p1006_p4  ;;  %s219_s16 = int_to_ptr.vmem [resolvable:$true] %s218_s16 }
  0x15   : > { %p713_p1 = scmp.ge.s32.totalorder %s930_s23, 1  ;;  %p223_p2 = scmp.lt.s32.totalorder %s930_s23, 3 }
  0x16   : > { %s204_s24 = scalar_lea.sflag [#allocation3], %s203_s9 }
  0x17   : > { %758 = dma.hbm_to_vmem [thread:$0]  (!%p756_p0), %s217_s17, 128, %s219_s16, %s204_s24  }
  0x18   : > { %p224_p3 = pnand %p713_p1, %p223_p2 }
  0x19   : > { %s1039_s25 = sand.u32 (!%p224_p3), 1, %s914_s19  }
  0x1a   : > { %227 = sbr.rel (%p224_p3) target bundleno = 518 (0x206), region = 40  ;;  %s714_s27 = sshll.u32 (!%p224_p3), %s1039_s25, 3 }
  0x1b   : > { %s230_s29 = scalar_lea.sflag (!%p224_p3), [#allocation3], %s1039_s25  ;;  %s233_s10 = scalar_lea.vmem (!%p224_p3), [#allocation2], %s714_s27 }
  0x1f   : > { %901 = dma.done.wait (%p1012_p8), %s230_s29, 128  }
  0x20   : > { %903 = vsyncadd (%p1012_p8), %s230_s29, 4294967168  ;;  %v263_v0 = vld [vmem:[%s233_s10] sm:$0xff]  ;;  %vm285_vm0 = vcmask 1043456   ;;  %vm272_vm1 = vcmask 31744   ;;  %v264_v4 = vld [vmem:[%s1170_s1] sm:$0xff]  ;;  %vm376_vm10 = vcmask 261120  }
  0x21   : > { %269 = vst [vmem:[#allocation1] ss:$2 sm:$0xff] %v263_v0  ;;  %v266_v1 = vld [vmem:[%s1170_s1 + $0x10] sm:$0xff]  ;;  %v267_v5 = vld [vmem:[%s1170_s1 + $0x18] sm:$0xff]  ;;  %v265_v6 = vld [vmem:[%s1170_s1 + $0x8] sm:$0xff]  ;;  %v932_v39 = vmov 0  }
  0x22   : > { %v372_v29 = vld [vmem:[%s1171_s2] sm:$0xff]  ;;  %v373_v32 = vld [vmem:[%s1171_s2 + $0x8] sm:$0xff]  ;;  %v374_v33 = vld [vmem:[%s1171_s2 + $0x10] sm:$0xff]  ;;  %816 = vset.pattern.permute.xlu0 %v932_v39  ;;  %817 = vset.pattern.permute.xlu1 %v932_v39  ;;  %s715_s30 = sshll.u32 %s1039_s25, 6  ;;  %s748_s14 = sshll.u32 %s922_s21, 6 }
  0x23   : > { %v375_v34 = vld [vmem:[%s1171_s2 + $0x18] sm:$0xff]  ;;  %v475_v40 = vld [vmem:[%s1173_s4] sm:$0xff]  ;;  %v476_v43 = vld [vmem:[%s1173_s4 + $0x8] sm:$0xff]  ;;  %s1120_s13 = scalar_lea.vmem [#allocation5], %s715_s30  ;;  %s615_s17 = scalar_lea.hbm %s1174_s5, %s748_s14 }
  0x24   : > { %481 = vperm.xlu0 %816, %v475_v40   ;;  %v477_v44 = vld [vmem:[%s1173_s4 + $0x10] sm:$0xff]  ;;  %v478_v55 = vld [vmem:[%s1173_s4 + $0x18] sm:$0xff]  ;;  %v471_v62 = vld [vmem:[%s1172_s3] sm:$0xff]  ;;  %s616_s21 = sshll.u32 %s1120_s13, 4  ;;  %s618_s24 = sshll.u32 %s615_s17, 4  ;;  %s617_s21 = int_to_ptr.vmem [resolvable:$true] %s616_s21  ;;  %s619_s24 = int_to_ptr.hbm [resolvable:$true] %s618_s24 }
  0x25   : > { %491 = vperm.xlu1 %817, %v477_v44   ;;  %s602_s27 = scalar_lea.sflag [#allocation4], %s1039_s25  ;;  %s862_s29 = sshra.s32 %s619_s24, 4  ;;  %s863_s29 = int_to_ptr.hbm [resolvable:$true] %s862_s29 }
  0x26   : > { %s864_s10 = scalar_lea.hbm %s863_s29, 64  ;;  %s868_s11 = scalar_lea.hbm %s1174_s5, 128 }
  0x27   : > { %p865_p4 = scmp.ne.s32.totalorder %s863_s29, %s864_s10  ;;  %p869_p7 = scmp.lt.s32.totalorder %s863_s29, %s1174_s5 }
  0x28   : > { %v270_v2 = vld.sshfl [vmem:[#allocation1] sm:$0xff pattern:$0x75316420]  ;;  %v271_v3 = vld.sshfl [vmem:[#allocation1 + $0x8] sm:$0xff pattern:$0x75316420]  ;;  %p870_p8 = scmp.lt.s32.totalorder %s868_s11, %s864_s10 }
  0x29   : > { %749 = vmatpush.msk.msra.mxu2 %vm285_vm0, %v270_v2  ;;  %750 = vmatpush.msk.msra.mxu3 %vm285_vm0, %v271_v3  ;;  %p866_p5 = pnand %p865_p4, %p1016_p9 }
  0x2a   : > { %719 = vmatmul.msk.f32.vlgmr.msra.gmra.mxu2 %vm272_vm1, %v266_v1  ;;  %724 = vmatmul.msk.f32.vlgmr.msra.gmra.mxu3 %vm272_vm1, %v266_v1  ;;  %v472_v1 = vld [vmem:[%s1172_s3 + $0x8] sm:$0xff]  ;;  %p871_p10 = por %p870_p8, %p869_p7 }
  0x2b   : > { %716 = vmatpush.msk.msra.mxu0 %vm285_vm0, %v270_v2  ;;  %721 = vmatpush.msk.msra.mxu1 %vm285_vm0, %v271_v3  ;;  %v473_v2 = vld [vmem:[%s1172_s3 + $0x10] sm:$0xff]  ;;  %v474_v3 = vld [vmem:[%s1172_s3 + $0x18] sm:$0xff]  ;;  %p867_p6 = pneg %p866_p5 }
  0x2c   : > { %717 = vmatmul.msk.f32.vlgmr.msra.gmra.mxu0 %vm272_vm1, %v264_v4  ;;  %722 = vmatmul.msk.f32.vlgmr.msra.gmra.mxu1 %vm272_vm1, %v264_v4 }
  0x2d   : > { %486 = vperm.xlu0 %816, %v476_v43   ;;  %496 = vperm.xlu1 %817, %v478_v55   ;;  %p872_p13 = pnand %p871_p10, %p867_p6 }
  0x32   : > { %720 = vmatmul.msk.f32.gmra.mxu2 %vm272_vm1, %v267_v5  ;;  %725 = vmatmul.msk.f32.gmra.mxu3 %vm272_vm1, %v267_v5 }
  0x34   : > { %718 = vmatmul.msk.f32.gmra.mxu0 %vm272_vm1, %v265_v6  ;;  %723 = vmatmul.msk.f32.gmra.mxu1 %vm272_vm1, %v265_v6 }
  0x96   : > { %v482_v4 = vpop.permute.xlu0 %481 }
  0xa9   : > { %v307_v7 = vpop.f32.mrf.mxu0  ;;  %v336_v8 = vpop.f32.mrf.mxu1 }
  0xaa   : > { %v356_v23 = vmul.f32 0.01, %v307_v7  ;;  %v357_v24 = vmul.f32 0.01, %v336_v8  ;;  %vm348_vm8 = vcmp.gt.f32.partialorder %v307_v7, 0.0  ;;  %vm349_vm9 = vcmp.gt.f32.partialorder %v336_v8, 0.0 }
  0xac   : > { %v364_v30 = vsel %vm348_vm8, %v307_v7, %v356_v23  ;;  %v365_v31 = vsel %vm349_vm9, %v336_v8, %v357_v24 }
  0xad   : > { %v313_v9 = vpop.f32.mrf.mxu2  ;;  %v342_v10 = vpop.f32.mrf.mxu3 }
  0xae   : > { %v360_v13 = vmul.f32 0.01, %v313_v9  ;;  %v361_v14 = vmul.f32 0.01, %v342_v10  ;;  %vm352_vm4 = vcmp.gt.f32.partialorder %v313_v9, 0.0  ;;  %vm353_vm5 = vcmp.gt.f32.partialorder %v342_v10, 0.0 }
  0xb0   : > { %v368_v25 = vsel %vm352_vm4, %v313_v9, %v360_v13  ;;  %v369_v26 = vsel %vm353_vm5, %v342_v10, %v361_v14  ;;  %v487_v13 = vpop.permute.xlu0 %486 }
  0xb1   : > { %v310_v11 = vpop.f32.mrf.mxu0  ;;  %v339_v12 = vpop.f32.mrf.mxu1 }
  0xb2   : > { %v358_v19 = vmul.f32 0.01, %v310_v11  ;;  %v359_v20 = vmul.f32 0.01, %v339_v12  ;;  %vm350_vm6 = vcmp.gt.f32.partialorder %v310_v11, 0.0  ;;  %vm351_vm7 = vcmp.gt.f32.partialorder %v339_v12, 0.0 }
  0xb4   : > { %v366_v27 = vsel %vm350_vm6, %v310_v11, %v358_v19  ;;  %v367_v28 = vsel %vm351_vm7, %v339_v12, %v359_v20 }
  0xb5   : > { %v316_v15 = vpop.f32.mrf.mxu2  ;;  %v345_v16 = vpop.f32.mrf.mxu3 }
  0xb6   : > { %v362_v17 = vmul.f32 0.01, %v316_v15  ;;  %v363_v18 = vmul.f32 0.01, %v345_v16  ;;  %vm354_vm2 = vcmp.gt.f32.partialorder %v316_v15, 0.0  ;;  %vm355_vm3 = vcmp.gt.f32.partialorder %v345_v16, 0.0 }
  0xb8   : > { %v370_v21 = vsel %vm354_vm2, %v316_v15, %v362_v17  ;;  %v371_v22 = vsel %vm355_vm3, %v345_v16, %v363_v18 }
  0xb9   : > { %401 = vmatpush.msrb.mxu2 %v370_v21  ;;  %430 = vmatpush.msrb.mxu3 %v371_v22  ;;  %v492_v22 = vpop.permute.xlu1 %491 }
  0xbb   : > { %402 = vmatpush.msrb.mxu2 %v368_v25  ;;  %431 = vmatpush.msrb.mxu3 %v369_v26 }
  0xbd   : > { %403 = vmatpush.msrb.mxu2 %v366_v27  ;;  %432 = vmatpush.msrb.mxu3 %v367_v28 }
  0xbf   : > { %404 = vmatpush.msrb.mxu2 %v364_v30  ;;  %433 = vmatpush.msrb.mxu3 %v365_v31 }
  0xc0   : > { %726 = vmatmul.msk.f32.vlgmr.msrb.gmra.mxu2 %vm376_vm10, %v372_v29  ;;  %730 = vmatmul.msk.f32.vlgmr.msrb.gmra.mxu3 %vm376_vm10, %v372_v29 }
  0xc1   : > { %v497_v31 = vpop.permute.xlu1 %496 }
  0xc8   : > { %727 = vmatmul.msk.f32.gmra.mxu2 %vm376_vm10, %v373_v32  ;;  %731 = vmatmul.msk.f32.gmra.mxu3 %vm376_vm10, %v373_v32 }
  0xd0   : > { %728 = vmatmul.msk.f32.gmra.mxu2 %vm376_vm10, %v374_v33  ;;  %732 = vmatmul.msk.f32.gmra.mxu3 %vm376_vm10, %v374_v33 }
  0xd8   : > { %729 = vmatmul.msk.f32.gmra.mxu2 %vm376_vm10, %v375_v34  ;;  %733 = vmatmul.msk.f32.gmra.mxu3 %vm376_vm10, %v375_v34 }
 0x143   : > { %v406_v35 = vpop.f32.mrf.mxu2  ;;  %v435_v36 = vpop.f32.mrf.mxu3 }
 0x144   : > { %v455_v56 = vmul.f32 0.01, %v406_v35  ;;  %v456_v57 = vmul.f32 0.01, %v435_v36  ;;  %vm447_vm1 = vcmp.gt.f32.partialorder %v406_v35, 0.0  ;;  %vm448_vm2 = vcmp.gt.f32.partialorder %v435_v36, 0.0 }
 0x146   : > { %v463_v63 = vsel %vm447_vm1, %v406_v35, %v455_v56  ;;  %v464_v0 = vsel %vm448_vm2, %v435_v36, %v456_v57 }
 0x14b   : > { %v409_v37 = vpop.f32.mrf.mxu2  ;;  %v438_v38 = vpop.f32.mrf.mxu3 }
 0x14c   : > { %v457_v51 = vmul.f32 0.01, %v409_v37  ;;  %v458_v52 = vmul.f32 0.01, %v438_v38  ;;  %vm449_vm15 = vcmp.gt.f32.partialorder %v409_v37, 0.0  ;;  %vm450_vm0 = vcmp.gt.f32.partialorder %v438_v38, 0.0 }
 0x14e   : > { %v465_v60 = vsel %vm449_vm15, %v409_v37, %v457_v51  ;;  %v466_v61 = vsel %vm450_vm0, %v438_v38, %v458_v52 }
 0x153   : > { %v412_v41 = vpop.f32.mrf.mxu2  ;;  %v441_v42 = vpop.f32.mrf.mxu3 }
 0x154   : > { %v459_v45 = vmul.f32 0.01, %v412_v41  ;;  %v460_v46 = vmul.f32 0.01, %v441_v42  ;;  %vm451_vm13 = vcmp.gt.f32.partialorder %v412_v41, 0.0  ;;  %vm452_vm14 = vcmp.gt.f32.partialorder %v441_v42, 0.0 }
 0x156   : > { %v467_v58 = vsel %vm451_vm13, %v412_v41, %v459_v45  ;;  %v468_v59 = vsel %vm452_vm14, %v441_v42, %v460_v46 }
 0x15b   : > { %v415_v47 = vpop.f32.mrf.mxu2  ;;  %v444_v48 = vpop.f32.mrf.mxu3 }
 0x15c   : > { %vm453_vm11 = vcmp.gt.f32.partialorder %v415_v47, 0.0  ;;  %v461_v49 = vmul.f32 0.01, %v415_v47  ;;  %vm454_vm12 = vcmp.gt.f32.partialorder %v444_v48, 0.0  ;;  %v462_v50 = vmul.f32 0.01, %v444_v48 }
 0x15e   : > { %v469_v53 = vsel %vm453_vm11, %v415_v47, %v461_v49  ;;  %v470_v54 = vsel %vm454_vm12, %v444_v48, %v462_v50 }
 0x15f   : > { %523 = vmatpush.msrb.mxu0 %v469_v53  ;;  %552 = vmatpush.msrb.mxu1 %v470_v54 }
 0x161   : > { %524 = vmatpush.msrb.mxu0 %v467_v58  ;;  %553 = vmatpush.msrb.mxu1 %v468_v59 }
 0x163   : > { %525 = vmatpush.msrb.mxu0 %v465_v60  ;;  %554 = vmatpush.msrb.mxu1 %v466_v61 }
 0x165   : > { %526 = vmatpush.msrb.mxu0 %v463_v63  ;;  %555 = vmatpush.msrb.mxu1 %v464_v0 }
 0x166   : > { %734 = vmatmul.msk.f32.vlgmr.msrb.gmra.mxu0 %vm376_vm10, %v471_v62  ;;  %738 = vmatmul.msk.f32.vlgmr.msrb.gmra.mxu1 %vm376_vm10, %v471_v62 }
 0x16e   : > { %735 = vmatmul.msk.f32.gmra.mxu0 %vm376_vm10, %v472_v1  ;;  %739 = vmatmul.msk.f32.gmra.mxu1 %vm376_vm10, %v472_v1 }
 0x176   : > { %736 = vmatmul.msk.f32.gmra.mxu0 %vm376_vm10, %v473_v2  ;;  %740 = vmatmul.msk.f32.gmra.mxu1 %vm376_vm10, %v473_v2 }
 0x17e   : > { %737 = vmatmul.msk.f32.gmra.mxu0 %vm376_vm10, %v474_v3  ;;  %741 = vmatmul.msk.f32.gmra.mxu1 %vm376_vm10, %v474_v3 }
 0x1e3   : > { %v528_v5 = vpop.f32.mrf.mxu0  ;;  %v557_v6 = vpop.f32.mrf.mxu1 }
 0x1e4   : > { %v529_v7 = vadd.f32 %v528_v5, %v482_v4  ;;  %v558_v8 = vadd.f32 %v557_v6, %v482_v4 }
 0x1e6   : > { %vm569_vm3 = vcmp.gt.f32.partialorder %v529_v7, 0.0  ;;  %vm570_vm4 = vcmp.gt.f32.partialorder %v558_v8, 0.0  ;;  %v577_v9 = vmul.f32 0.01, %v529_v7  ;;  %v578_v10 = vmul.f32 0.01, %v558_v8 }
 0x1e8   : > { %v585_v11 = vsel %vm569_vm3, %v529_v7, %v577_v9  ;;  %v586_v12 = vsel %vm570_vm4, %v558_v8, %v578_v10 }
 0x1e9   : > { %593 = vst [vmem:[%s1120_s13] sm:$0xff] %v585_v11 }
 0x1ea   : > { %594 = vst [vmem:[%s1120_s13 + $0x8] sm:$0xff] %v586_v12 }
 0x1eb   : > { %v531_v14 = vpop.f32.mrf.mxu0  ;;  %v560_v15 = vpop.f32.mrf.mxu1 }
 0x1ec   : > { %v532_v16 = vadd.f32 %v531_v14, %v487_v13  ;;  %v561_v17 = vadd.f32 %v560_v15, %v487_v13 }
 0x1ee   : > { %vm571_vm5 = vcmp.gt.f32.partialorder %v532_v16, 0.0  ;;  %vm572_vm6 = vcmp.gt.f32.partialorder %v561_v17, 0.0  ;;  %v579_v18 = vmul.f32 0.01, %v532_v16  ;;  %v580_v19 = vmul.f32 0.01, %v561_v17 }
 0x1f0   : > { %v587_v20 = vsel %vm571_vm5, %v532_v16, %v579_v18  ;;  %v588_v21 = vsel %vm572_vm6, %v561_v17, %v580_v19 }
 0x1f1   : > { %595 = vst [vmem:[%s1120_s13 + $0x10] sm:$0xff] %v587_v20 }
 0x1f2   : > { %596 = vst [vmem:[%s1120_s13 + $0x18] sm:$0xff] %v588_v21 }
 0x1f3   : > { %v534_v23 = vpop.f32.mrf.mxu0  ;;  %v563_v24 = vpop.f32.mrf.mxu1 }
 0x1f4   : > { %v535_v25 = vadd.f32 %v534_v23, %v492_v22  ;;  %v564_v26 = vadd.f32 %v563_v24, %v492_v22 }
 0x1f6   : > { %vm573_vm7 = vcmp.gt.f32.partialorder %v535_v25, 0.0  ;;  %v581_v27 = vmul.f32 0.01, %v535_v25  ;;  %vm574_vm8 = vcmp.gt.f32.partialorder %v564_v26, 0.0  ;;  %v582_v28 = vmul.f32 0.01, %v564_v26 }
 0x1f8   : > { %v589_v29 = vsel %vm573_vm7, %v535_v25, %v581_v27  ;;  %v590_v30 = vsel %vm574_vm8, %v564_v26, %v582_v28 }
 0x1f9   : > { %597 = vst [vmem:[%s1120_s13 + $0x20] sm:$0xff] %v589_v29 }
 0x1fa   : > { %598 = vst [vmem:[%s1120_s13 + $0x28] sm:$0xff] %v590_v30 }
 0x1fb   : > { %v537_v32 = vpop.f32.mrf.mxu0  ;;  %v566_v33 = vpop.f32.mrf.mxu1 }
 0x1fc   : > { %v538_v34 = vadd.f32 %v537_v32, %v497_v31  ;;  %v567_v35 = vadd.f32 %v566_v33, %v497_v31 }
 0x1fe   : > { %vm575_vm9 = vcmp.gt.f32.partialorder %v538_v34, 0.0  ;;  %v583_v36 = vmul.f32 0.01, %v538_v34  ;;  %vm576_vm10 = vcmp.gt.f32.partialorder %v567_v35, 0.0  ;;  %v584_v37 = vmul.f32 0.01, %v567_v35 }
 0x200   : > { %v591_v38 = vsel %vm575_vm9, %v538_v34, %v583_v36  ;;  %v592_v39 = vsel %vm576_vm10, %v567_v35, %v584_v37 }
 0x201   : > { %599 = vst [vmem:[%s1120_s13 + $0x30] sm:$0xff] %v591_v38 }
 0x202   : > { %600 = vst [vmem:[%s1120_s13 + $0x38] sm:$0xff] %v592_v39 }
 0x203   : > { %875 = shalt.err (!%p872_p13)
}
 0x204   : > { %s933_s25 = smov 256   ;;  %s934_s13 = smov 16  }
 0x205   : > { %753 = dma.vmem_to_hbm [thread:$0]  (%p1016_p9), %s617_s21, 1024, %s619_s24, %s602_s27, %s933_s25, %s933_s25, %s934_s13  }
 0x206 PF: > { %s633_s14 = sand.u32 1, %s910_s18   ;;  %p760_p0 = pnand %p709_p12, %p1023_p11 }
 0x207   : > { %s634_s15 = scalar_lea.sflag [#allocation4], %s633_s14 }
 0x208   : > { %p761_p1 = pneg %p760_p0 }
 0x20a   : > { %905 = dma.done.wait (%p761_p1), %s634_s15, 1024  }
 0x20b   : > { %907 = vsyncadd (%p761_p1), %s634_s15, 4294966272  ;;  %s21_s23 = sadd.s32 1, %s930_s23   ;;  %s1179_s18 = smov %s914_s19 }
 0x20c   : > { %p18_p2 = scmp.ge.s32.totalorder %s21_s23, 4   ;;  %s1180_s19 = smov %s918_s20 }
 0x20d   : > { %s1181_s20 = smov %s1021_s7  ;;  %s1182_s21 = smov %s926_s22 }
 0x20e   : > { %s1183_s22 = smov %s1185_s26  ;;  %20 = sbr.rel (!%p18_p2) target bundleno = 6 (0x6), region = 85 }
 0x213   :  { %640 = vsyncpa [#allocation3], 1 }
 0x214   :  { %642 = vsyncpa [#allocation3 + $0x1], 1 }
 0x215   :  { %643 = vsyncpa [#allocation4], 1 }
 0x216   :  { %645 = vsyncpa [#allocation4 + $0x1], 1 }

</bundles_post_ra>
